<compile_context>
chip_gen: v5e
topology: v5e:2x2
jax: 0.10.0
libtpu: 0.0.40
codegen_flags: <defaults>
</compile_context>

<pallas_src>
import functools

import jax
import jax.numpy as jnp
from jax.experimental import pallas as pl
from jax.experimental.pallas import tpu as pltpu


def _round_up(x: int, m: int) -> int:
    return (x + m - 1) // m * m


def _cdiv(a: int, b: int) -> int:
    return (a + b - 1) // b


def _sublane(dtype) -> int:
    # sublane packing: 8 rows for 32-bit, 16 for 16-bit, 32 for 8-bit dtypes
    return 8 * max(1, 4 // jnp.dtype(dtype).itemsize)


def _tile_bytes(rows: int, cols: int, dtype) -> int:
    # padded VMEM footprint of a 2-D [rows, cols] tile
    it = jnp.dtype(dtype).itemsize
    return _round_up(max(rows, 1), _sublane(dtype)) * _round_up(max(cols, 1), 128) * it


def classifier_kernel(feat_ref, w1_ref, b1_ref, w2_ref, b2_ref, out_ref,
                      acc_ref, *, inv_seq_len, seq_rows, ts, mask_tail):
    # feat_ref: [TB, TS, Hf]   w1_ref: [Hf, HID]   b1_ref: [1, HID]
    # w2_ref:   [HID, Lp]      b2_ref: [1, Lp]     out_ref: [TB, Lp]
    # acc_ref:  [TB, Hf] f32 scratch (seq-sum accumulator, resident across k)
    k = pl.program_id(1)
    last = pl.num_programs(1) - 1

    @pl.when(k == 0)
    def _():
        acc_ref[...] = jnp.zeros_like(acc_ref)

    if mask_tail:
        # Hot path: full chunks need no masking.
        @pl.when(k < last)
        def _():
            acc_ref[...] += jnp.sum(feat_ref[...], axis=1, dtype=jnp.float32)

        # Ragged tail chunk: zero out rows beyond the true seq length before
        # accumulating (the OOB part of a partial block holds garbage).
        @pl.when(k == last)
        def _():
            chunk = feat_ref[...]
            row = k * ts + jax.lax.broadcasted_iota(jnp.int32, chunk.shape, 1)
            chunk = jnp.where(row < seq_rows, chunk, jnp.zeros_like(chunk))
            acc_ref[...] += jnp.sum(chunk, axis=1, dtype=jnp.float32)
    else:
        acc_ref[...] += jnp.sum(feat_ref[...], axis=1, dtype=jnp.float32)

    @pl.when(k == last)
    def _():
        x = acc_ref[...] * inv_seq_len                              # [TB, Hf] f32
        # dropout: eval-mode identity
        h = jnp.dot(x, w1_ref[...].astype(jnp.float32),
                    preferred_element_type=jnp.float32)
        h = jnp.tanh(h + b1_ref[...].astype(jnp.float32))           # [TB, HID]
        logits = jnp.dot(h, w2_ref[...].astype(jnp.float32),
                         preferred_element_type=jnp.float32)
        logits = logits + b2_ref[...].astype(jnp.float32)           # [TB, Lp]
        out_ref[...] = logits.astype(out_ref.dtype)


def classifier_forward(features, w1, b1, w2, b2):
    """features: [B, S, H]; w1: [H, HID]; b1: [HID]; w2: [HID, L]; b2: [L]."""
    B, S, H = features.shape
    HID = w1.shape[1]
    L = w2.shape[1]
    f_dtype = features.dtype
    itemsize = jnp.dtype(f_dtype).itemsize

    # ---- lane-density fold for small H (free contiguous reshape) -------------
    # [B, S, H] -> [B, S/G, G*H] with G*H == 128; W1 is vertically tiled G times
    # so sum-over-groups is absorbed into the (tiny) epilogue matmul.
    if H < 128 and 128 % H == 0 and S % (128 // H) == 0:
        G = 128 // H
    else:
        G = 1
    Hf = G * H
    Sf = S // G
    feat = features.reshape(B, Sf, Hf) if G > 1 else features
    w1_f = jnp.tile(w1, (G, 1)) if G > 1 else w1                    # [Hf, HID]

    # ---- lane-dense output / 2-D biases (tiny pads only; never the features) -
    L_pad = _round_up(L, 128)
    w2_p = w2 if L_pad == L else jnp.pad(w2, ((0, 0), (0, L_pad - L)))
    b2_p = (b2 if L_pad == L else jnp.pad(b2, (0, L_pad - L))).reshape(1, L_pad)
    b1_2d = b1.reshape(1, HID)

    # ---- batch tile: no padding; partial last block's OOB writes are dropped --
    if B <= 8:
        TB = B                        # block dim == full dim, no constraint issue
    elif B < 16:
        TB = 8
    else:
        # >= 2 programs on the "parallel" axis so v7x megacore can shard it.
        TB = min(128, _round_up(_cdiv(B, 2), 8))
    grid_b = _cdiv(B, TB)

    # ---- generation-aware VMEM budget & seq-chunk sizing ---------------------
    try:
        vmem_cap = int(pltpu.get_tpu_info().vmem_capacity_bytes)
    except Exception:
        vmem_cap = 64 * 1024 * 1024   # v7x per-core size: safe floor everywhere
    vmem_limit = min(vmem_cap * 3 // 4, 100 * 1024 * 1024)

    # Fixed (non-feature) footprint, using padded tile sizes.  Weights counted
    # double-buffered to stay safe if the Buffered(1) path is unavailable.
    fixed = (2 * _tile_bytes(Hf, HID, w1_f.dtype)
             + 2 * _tile_bytes(1, HID, b1.dtype)
             + 2 * _tile_bytes(HID, L_pad, w2_p.dtype)
             + 2 * _tile_bytes(1, L_pad, b2_p.dtype)
             + _tile_bytes(TB, Hf, jnp.float32)           # acc scratch
             + 2 * _tile_bytes(TB, L_pad, jnp.float32))   # output (double buffer)
    headroom = 2 * 1024 * 1024
    per_buf = max(512 * 1024, (vmem_limit - fixed - headroom) // 2)
    per_buf = min(per_buf, 16 * 1024 * 1024)              # per feature buffer

    sub = _sublane(f_dtype)
    row_bytes = TB * _round_up(Hf, 128) * itemsize        # one (padded) seq row
    max_rows = max(sub, per_buf // max(row_bytes, 1))
    if Sf <= max_rows:
        TS = Sf                                           # single chunk, no tail
    else:
        TS = max(sub, (max_rows // sub) * sub)            # sublane-aligned chunk
    grid_k = _cdiv(Sf, TS)
    mask_tail = (Sf % TS) != 0

    kernel = functools.partial(classifier_kernel, inv_seq_len=1.0 / S,
                               seq_rows=Sf, ts=TS, mask_tail=mask_tail)

    cost = pl.CostEstimate(
        flops=(B * S * H                      # pooling adds
               + 2 * B * Hf * HID             # dense
               + 2 * B * HID * L_pad),        # out_proj
        transcendentals=B * HID,              # tanh
        bytes_accessed=(feat.size * itemsize
                        + w1_f.size * jnp.dtype(w1_f.dtype).itemsize
                        + w2_p.size * jnp.dtype(w2_p.dtype).itemsize
                        + B * L_pad * 4),
    )

    def _build(single_buffer_weights):
        wmode = ({"pipeline_mode": pl.Buffered(1)}
                 if single_buffer_weights else {})
        return pl.pallas_call(
            kernel,
            out_shape=jax.ShapeDtypeStruct((B, L_pad), jnp.float32),
            grid_spec=pltpu.PrefetchScalarGridSpec(
                num_scalar_prefetch=0,
                grid=(grid_b, grid_k),
                in_specs=[
                    # streamed feature blocks (double-buffered)
                    pl.BlockSpec((TB, TS, Hf), lambda i, k: (i, k, 0)),
                    # weights/biases: constant index_map -> VMEM-resident
                    pl.BlockSpec((Hf, HID), lambda i, k: (0, 0), **wmode),
                    pl.BlockSpec((1, HID), lambda i, k: (0, 0), **wmode),
                    pl.BlockSpec((HID, L_pad), lambda i, k: (0, 0), **wmode),
                    pl.BlockSpec((1, L_pad), lambda i, k: (0, 0), **wmode),
                ],
                out_specs=pl.BlockSpec((TB, L_pad), lambda i, k: (i, 0)),
                scratch_shapes=[pltpu.VMEM((TB, Hf), jnp.float32)],
            ),
            compiler_params=pltpu.CompilerParams(
                dimension_semantics=("parallel", "arbitrary"),
                vmem_limit_bytes=vmem_limit,
            ),
            cost_estimate=cost,
        )

    try:
        out = _build(True)(feat, w1_f, b1_2d, w2_p, b2_p)
    except Exception:
        # This jax version rejects single-buffering; fall back to defaults.
        out = _build(False)(feat, w1_f, b1_2d, w2_p, b2_p)

    return out[:, :L]


def reference_forward(features, w1, b1, w2, b2):
    x = jnp.mean(features.astype(jnp.float32), axis=1)
    x = jnp.tanh(x @ w1.astype(jnp.float32) + b1)
    return x @ w2.astype(jnp.float32) + b2


if __name__ == "__main__":
    # Small shapes consistent with the module:
    #   args.hidden_size = 32, classifier inner hidden = 384 (module default),
    #   args.num_labels = 4, batch = 2, seq = 8.
    B, S, H = 2, 8, 32
    HID, L = 384, 4

    key = jax.random.PRNGKey(0)
    k_feat, k_w1, k_b1, k_w2, k_b2 = jax.random.split(key, 5)

    features = jax.random.normal(k_feat, (B, S, H), dtype=jnp.float32)
    # Linear weights stored as [in_features, out_features] (transpose of
    # nn.Linear storage) so the kernel computes x @ W + b directly.
    w1 = jax.random.normal(k_w1, (H, HID), dtype=jnp.float32) * 0.02
    b1 = jax.random.normal(k_b1, (HID,), dtype=jnp.float32) * 0.02
    w2 = jax.random.normal(k_w2, (HID, L), dtype=jnp.float32) * 0.02
    b2 = jax.random.normal(k_b2, (L,), dtype=jnp.float32) * 0.02

    out = classifier_forward(features, w1, b1, w2, b2)
    out = jax.block_until_ready(out)

    ref = reference_forward(features, w1, b1, w2, b2)
    assert out.shape == (B, L), out.shape
    assert jnp.allclose(out, ref, atol=1e-4, rtol=1e-4), (
        f"max abs err {jnp.max(jnp.abs(out - ref))}")

    print("KERNEL_OK")
</pallas_src>

<mosaic_0001>
module attributes {stable_mosaic.version = 11 : i64} {
  func.func @classifier_kernel(%arg0: i32, %arg1: i32, %arg2: memref<2x2x128xf32, #tpu.memory_space<vmem>>, %arg3: memref<128x384xf32, #tpu.memory_space<vmem>>, %arg4: memref<1x384xf32, #tpu.memory_space<vmem>>, %arg5: memref<384x128xf32, #tpu.memory_space<vmem>>, %arg6: memref<1x128xf32, #tpu.memory_space<vmem>>, %arg7: memref<2x128xf32, #tpu.memory_space<vmem>>, %arg8: memref<2x128xf32, #tpu.memory_space<vmem>>) attributes {dimension_semantics = [#tpu.dimension_semantics<parallel>, #tpu.dimension_semantics<arbitrary>], iteration_bounds = array<i64: 1, 1>, scalar_prefetch = 0 : i64, scratch_operands = 1 : i64, tpu.core_type = #tpu.core_type<tc>, window_params = [{transform_indices = @transform_0, window_bounds = array<i64: 2, 2, 128>}, {pipeline_mode = #tpu.pipeline_mode<synchronous>, transform_indices = @transform_1, window_bounds = array<i64: 128, 384>}, {pipeline_mode = #tpu.pipeline_mode<synchronous>, transform_indices = @transform_2, window_bounds = array<i64: 1, 384>}, {pipeline_mode = #tpu.pipeline_mode<synchronous>, transform_indices = @transform_3, window_bounds = array<i64: 384, 128>}, {pipeline_mode = #tpu.pipeline_mode<synchronous>, transform_indices = @transform_4, window_bounds = array<i64: 1, 128>}, {transform_indices = @transform_5, window_bounds = array<i64: 2, 128>}]} {
    %c0_i32 = arith.constant 0 : i32
    %0 = arith.cmpi eq, %arg1, %c0_i32 : i32
    %1 = arith.extui %0 : i1 to i32
    %c0_i32_0 = arith.constant 0 : i32
    %2 = arith.cmpi ne, %1, %c0_i32_0 : i32
    scf.if %2 {
      %cst_9 = arith.constant 0.000000e+00 : f32
      %11 = vector.broadcast %cst_9 : f32 to vector<2x128xf32>
      %c0_10 = arith.constant 0 : index
      %c0_11 = arith.constant 0 : index
      %12 = vector.load %arg8[%c0_10, %c0_11] : memref<2x128xf32, #tpu.memory_space<vmem>>, vector<2x128xf32>
      tpu.vector_store %arg8[%c0_10, %c0_11], %11 {strides = array<i32>} : memref<2x128xf32, #tpu.memory_space<vmem>>, vector<2x128xf32>,
    } else {
    }
    %c0 = arith.constant 0 : index
    %c0_1 = arith.constant 0 : index
    %3 = vector.load %arg8[%c0, %c0_1] : memref<2x128xf32, #tpu.memory_space<vmem>>, vector<2x128xf32>
    %c0_2 = arith.constant 0 : index
    %c0_3 = arith.constant 0 : index
    %c0_4 = arith.constant 0 : index
    %4 = vector.load %arg2[%c0_2, %c0_3, %c0_4] : memref<2x2x128xf32, #tpu.memory_space<vmem>>, vector<2x2x128xf32>
    %cst = arith.constant dense<0.000000e+00> : vector<2x128xf32>
    %5 = vector.multi_reduction <add>, %4, %cst [1] : vector<2x2x128xf32> to vector<2x128xf32>
    %6 = arith.addf %3, %5 : vector<2x128xf32>
    %c0_5 = arith.constant 0 : index
    %c0_6 = arith.constant 0 : index
    %7 = vector.load %arg8[%c0_5, %c0_6] : memref<2x128xf32, #tpu.memory_space<vmem>>, vector<2x128xf32>
    tpu.vector_store %arg8[%c0_5, %c0_6], %6 {strides = array<i32>} : memref<2x128xf32, #tpu.memory_space<vmem>>, vector<2x128xf32>,
    %c0_i32_7 = arith.constant 0 : i32
    %8 = arith.cmpi eq, %arg1, %c0_i32_7 : i32
    %9 = arith.extui %8 : i1 to i32
    %c0_i32_8 = arith.constant 0 : i32
    %10 = arith.cmpi ne, %9, %c0_i32_8 : i32
    scf.if %10 {
      %c0_9 = arith.constant 0 : index
      %c0_10 = arith.constant 0 : index
      %11 = vector.load %arg8[%c0_9, %c0_10] : memref<2x128xf32, #tpu.memory_space<vmem>>, vector<2x128xf32>
      %cst_11 = arith.constant 1.250000e-01 : f32
      %12 = vector.broadcast %cst_11 : f32 to vector<2x128xf32>
      %13 = arith.mulf %11, %12 : vector<2x128xf32>
      %c0_12 = arith.constant 0 : index
      %c0_13 = arith.constant 0 : index
      %14 = vector.load %arg3[%c0_12, %c0_13] : memref<128x384xf32, #tpu.memory_space<vmem>>, vector<128x384xf32>
      %cst_14 = arith.constant dense<0.000000e+00> : vector<2x384xf32>
      %15 = tpu.matmul %13, %14, %cst_14 {dimension_numbers = #tpu.dot_dimension_numbers<[1], [0], [0], [1], [0, 0, 1, 1], [], []>} : vector<2x128xf32>, vector<128x384xf32>, vector<2x384xf32> -> vector<2x384xf32>
      %c0_15 = arith.constant 0 : index
      %c0_16 = arith.constant 0 : index
      %16 = vector.load %arg4[%c0_15, %c0_16] : memref<1x384xf32, #tpu.memory_space<vmem>>, vector<1x384xf32>
      %17 = vector.broadcast %16 : vector<1x384xf32> to vector<2x384xf32>
      %18 = arith.addf %15, %17 : vector<2x384xf32>
      %19 = math.tanh %18 : vector<2x384xf32>
      %c0_17 = arith.constant 0 : index
      %c0_18 = arith.constant 0 : index
      %20 = vector.load %arg5[%c0_17, %c0_18] : memref<384x128xf32, #tpu.memory_space<vmem>>, vector<384x128xf32>
      %cst_19 = arith.constant dense<0.000000e+00> : vector<2x128xf32>
      %21 = tpu.matmul %19, %20, %cst_19 {dimension_numbers = #tpu.dot_dimension_numbers<[1], [0], [0], [1], [0, 0, 1, 1], [], []>} : vector<2x384xf32>, vector<384x128xf32>, vector<2x128xf32> -> vector<2x128xf32>
      %c0_20 = arith.constant 0 : index
      %c0_21 = arith.constant 0 : index
      %22 = vector.load %arg6[%c0_20, %c0_21] : memref<1x128xf32, #tpu.memory_space<vmem>>, vector<1x128xf32>
      %23 = vector.broadcast %22 : vector<1x128xf32> to vector<2x128xf32>
      %24 = arith.addf %21, %23 : vector<2x128xf32>
      %c0_22 = arith.constant 0 : index
      %c0_23 = arith.constant 0 : index
      %25 = vector.load %arg7[%c0_22, %c0_23] : memref<2x128xf32, #tpu.memory_space<vmem>>, vector<2x128xf32>
      tpu.vector_store %arg7[%c0_22, %c0_23], %24 {strides = array<i32>} : memref<2x128xf32, #tpu.memory_space<vmem>>, vector<2x128xf32>,
    } else {
    }
    return
  }
  func.func @transform_0(%arg0: i32, %arg1: i32) -> (i32, i32, i32) {
    %c0_i32 = arith.constant 0 : i32
    %c0_i32_0 = arith.constant 0 : i32
    return %arg0, %arg1, %c0_i32 : i32, i32, i32
  }
  func.func @transform_1(%arg0: i32, %arg1: i32) -> (i32, i32) {
    %c0_i32 = arith.constant 0 : i32
    %c0_i32_0 = arith.constant 0 : i32
    %c0_i32_1 = arith.constant 0 : i32
    return %c0_i32, %c0_i32_0 : i32, i32
  }
  func.func @transform_2(%arg0: i32, %arg1: i32) -> (i32, i32) {
    %c0_i32 = arith.constant 0 : i32
    %c0_i32_0 = arith.constant 0 : i32
    %c0_i32_1 = arith.constant 0 : i32
    return %c0_i32, %c0_i32_0 : i32, i32
  }
  func.func @transform_3(%arg0: i32, %arg1: i32) -> (i32, i32) {
    %c0_i32 = arith.constant 0 : i32
    %c0_i32_0 = arith.constant 0 : i32
    %c0_i32_1 = arith.constant 0 : i32
    return %c0_i32, %c0_i32_0 : i32, i32
  }
  func.func @transform_4(%arg0: i32, %arg1: i32) -> (i32, i32) {
    %c0_i32 = arith.constant 0 : i32
    %c0_i32_0 = arith.constant 0 : i32
    %c0_i32_1 = arith.constant 0 : i32
    return %c0_i32, %c0_i32_0 : i32, i32
  }
  func.func @transform_5(%arg0: i32, %arg1: i32) -> (i32, i32) {
    %c0_i32 = arith.constant 0 : i32
    %c0_i32_0 = arith.constant 0 : i32
    return %arg0, %c0_i32 : i32, i32
  }
}

module attributes {stable_mosaic.version = 11 : i64} {
  func.func @classifier_kernel(%arg0: i32, %arg1: i32, %arg2: memref<2x2x128xf32, #tpu.memory_space<vmem>>, %arg3: memref<128x384xf32, #tpu.memory_space<vmem>>, %arg4: memref<1x384xf32, #tpu.memory_space<vmem>>, %arg5: memref<384x128xf32, #tpu.memory_space<vmem>>, %arg6: memref<1x128xf32, #tpu.memory_space<vmem>>, %arg7: memref<2x128xf32, #tpu.memory_space<vmem>>, %arg8: memref<2x128xf32, #tpu.memory_space<vmem>>) attributes {dimension_semantics = [#tpu.dimension_semantics<parallel>, #tpu.dimension_semantics<arbitrary>], iteration_bounds = array<i64: 1, 1>, scalar_prefetch = 0 : i64, scratch_operands = 1 : i64, tpu.core_type = #tpu.core_type<tc>, window_params = [{transform_indices = @transform_0, window_bounds = array<i64: 2, 2, 128>}, {pipeline_mode = #tpu.pipeline_mode<synchronous>, transform_indices = @transform_1, window_bounds = array<i64: 128, 384>}, {pipeline_mode = #tpu.pipeline_mode<synchronous>, transform_indices = @transform_2, window_bounds = array<i64: 1, 384>}, {pipeline_mode = #tpu.pipeline_mode<synchronous>, transform_indices = @transform_3, window_bounds = array<i64: 384, 128>}, {pipeline_mode = #tpu.pipeline_mode<synchronous>, transform_indices = @transform_4, window_bounds = array<i64: 1, 128>}, {transform_indices = @transform_5, window_bounds = array<i64: 2, 128>}]} {
    %c0_i32 = arith.constant 0 : i32
    %0 = arith.cmpi eq, %arg1, %c0_i32 : i32
    %1 = arith.extui %0 : i1 to i32
    %c0_i32_0 = arith.constant 0 : i32
    %2 = arith.cmpi ne, %1, %c0_i32_0 : i32
    scf.if %2 {
      %cst_9 = arith.constant 0.000000e+00 : f32
      %11 = vector.broadcast %cst_9 : f32 to vector<2x128xf32>
      %c0_10 = arith.constant 0 : index
      %c0_11 = arith.constant 0 : index
      %12 = vector.load %arg8[%c0_10, %c0_11] : memref<2x128xf32, #tpu.memory_space<vmem>>, vector<2x128xf32>
      tpu.vector_store %arg8[%c0_10, %c0_11], %11 {strides = array<i32>} : memref<2x128xf32, #tpu.memory_space<vmem>>, vector<2x128xf32>,
    } else {
    }
    %c0 = arith.constant 0 : index
    %c0_1 = arith.constant 0 : index
    %3 = vector.load %arg8[%c0, %c0_1] : memref<2x128xf32, #tpu.memory_space<vmem>>, vector<2x128xf32>
    %c0_2 = arith.constant 0 : index
    %c0_3 = arith.constant 0 : index
    %c0_4 = arith.constant 0 : index
    %4 = vector.load %arg2[%c0_2, %c0_3, %c0_4] : memref<2x2x128xf32, #tpu.memory_space<vmem>>, vector<2x2x128xf32>
    %cst = arith.constant dense<0.000000e+00> : vector<2x128xf32>
    %5 = vector.multi_reduction <add>, %4, %cst [1] : vector<2x2x128xf32> to vector<2x128xf32>
    %6 = arith.addf %3, %5 : vector<2x128xf32>
    %c0_5 = arith.constant 0 : index
    %c0_6 = arith.constant 0 : index
    %7 = vector.load %arg8[%c0_5, %c0_6] : memref<2x128xf32, #tpu.memory_space<vmem>>, vector<2x128xf32>
    tpu.vector_store %arg8[%c0_5, %c0_6], %6 {strides = array<i32>} : memref<2x128xf32, #tpu.memory_space<vmem>>, vector<2x128xf32>,
    %c0_i32_7 = arith.constant 0 : i32
    %8 = arith.cmpi eq, %arg1, %c0_i32_7 : i32
    %9 = arith.extui %8 : i1 to i32
    %c0_i32_8 = arith.constant 0 : i32
    %10 = arith.cmpi ne, %9, %c0_i32_8 : i32
    scf.if %10 {
      %c0_9 = arith.constant 0 : index
      %c0_10 = arith.constant 0 : index
      %11 = vector.load %arg8[%c0_9, %c0_10] : memref<2x128xf32, #tpu.memory_space<vmem>>, vector<2x128xf32>
      %cst_11 = arith.constant 1.250000e-01 : f32
      %12 = vector.broadcast %cst_11 : f32 to vector<2x128xf32>
      %13 = arith.mulf %11, %12 : vector<2x128xf32>
      %c0_12 = arith.constant 0 : index
      %c0_13 = arith.constant 0 : index
      %14 = vector.load %arg3[%c0_12, %c0_13] : memref<128x384xf32, #tpu.memory_space<vmem>>, vector<128x384xf32>
      %cst_14 = arith.constant dense<0.000000e+00> : vector<2x384xf32>
      %15 = tpu.matmul %13, %14, %cst_14 {dimension_numbers = #tpu.dot_dimension_numbers<[1], [0], [0], [1], [0, 0, 1, 1], [], []>} : vector<2x128xf32>, vector<128x384xf32>, vector<2x384xf32> -> vector<2x384xf32>
      %c0_15 = arith.constant 0 : index
      %c0_16 = arith.constant 0 : index
      %16 = vector.load %arg4[%c0_15, %c0_16] : memref<1x384xf32, #tpu.memory_space<vmem>>, vector<1x384xf32>
      %17 = vector.broadcast %16 : vector<1x384xf32> to vector<2x384xf32>
      %18 = arith.addf %15, %17 : vector<2x384xf32>
      %19 = math.tanh %18 : vector<2x384xf32>
      %c0_17 = arith.constant 0 : index
      %c0_18 = arith.constant 0 : index
      %20 = vector.load %arg5[%c0_17, %c0_18] : memref<384x128xf32, #tpu.memory_space<vmem>>, vector<384x128xf32>
      %cst_19 = arith.constant dense<0.000000e+00> : vector<2x128xf32>
      %21 = tpu.matmul %19, %20, %cst_19 {dimension_numbers = #tpu.dot_dimension_numbers<[1], [0], [0], [1], [0, 0, 1, 1], [], []>} : vector<2x384xf32>, vector<384x128xf32>, vector<2x128xf32> -> vector<2x128xf32>
      %c0_20 = arith.constant 0 : index
      %c0_21 = arith.constant 0 : index
      %22 = vector.load %arg6[%c0_20, %c0_21] : memref<1x128xf32, #tpu.memory_space<vmem>>, vector<1x128xf32>
      %23 = vector.broadcast %22 : vector<1x128xf32> to vector<2x128xf32>
      %24 = arith.addf %21, %23 : vector<2x128xf32>
      %c0_22 = arith.constant 0 : index
      %c0_23 = arith.constant 0 : index
      %25 = vector.load %arg7[%c0_22, %c0_23] : memref<2x128xf32, #tpu.memory_space<vmem>>, vector<2x128xf32>
      tpu.vector_store %arg7[%c0_22, %c0_23], %24 {strides = array<i32>} : memref<2x128xf32, #tpu.memory_space<vmem>>, vector<2x128xf32>,
    } else {
    }
    return
  }
  func.func @transform_0(%arg0: i32, %arg1: i32) -> (i32, i32, i32) {
    %c0_i32 = arith.constant 0 : i32
    %c0_i32_0 = arith.constant 0 : i32
    return %arg0, %arg1, %c0_i32 : i32, i32, i32
  }
  func.func @transform_1(%arg0: i32, %arg1: i32) -> (i32, i32) {
    %c0_i32 = arith.constant 0 : i32
    %c0_i32_0 = arith.constant 0 : i32
    %c0_i32_1 = arith.constant 0 : i32
    return %c0_i32, %c0_i32_0 : i32, i32
  }
  func.func @transform_2(%arg0: i32, %arg1: i32) -> (i32, i32) {
    %c0_i32 = arith.constant 0 : i32
    %c0_i32_0 = arith.constant 0 : i32
    %c0_i32_1 = arith.constant 0 : i32
    return %c0_i32, %c0_i32_0 : i32, i32
  }
  func.func @transform_3(%arg0: i32, %arg1: i32) -> (i32, i32) {
    %c0_i32 = arith.constant 0 : i32
    %c0_i32_0 = arith.constant 0 : i32
    %c0_i32_1 = arith.constant 0 : i32
    return %c0_i32, %c0_i32_0 : i32, i32
  }
  func.func @transform_4(%arg0: i32, %arg1: i32) -> (i32, i32) {
    %c0_i32 = arith.constant 0 : i32
    %c0_i32_0 = arith.constant 0 : i32
    %c0_i32_1 = arith.constant 0 : i32
    return %c0_i32, %c0_i32_0 : i32, i32
  }
  func.func @transform_5(%arg0: i32, %arg1: i32) -> (i32, i32) {
    %c0_i32 = arith.constant 0 : i32
    %c0_i32_0 = arith.constant 0 : i32
    return %arg0, %c0_i32 : i32, i32
  }
}

</mosaic_0001>

<bundles_post_ra>
// kernel: tpu_custom_call.1
= control target key start
LH: loop header
LB: loop body
LE: loop exit
PB: predicated region body
PF: predicated region fallthrough
CT: control target
= control target key end

     0   :  { %10 = vsyncpa [#allocation4], 0  ;;  %s575_s0 = inlined_call_operand.hbm [shape: f32[2,2,128], index: 0, kind: input, shape index: {}]   ;;  %s576_s1 = inlined_call_operand.hbm [shape: f32[128,384], index: 1, kind: input, shape index: {}]   ;;  %s577_s2 = inlined_call_operand.hbm [shape: f32[1,384], index: 2, kind: input, shape index: {}]   ;;  %s578_s3 = inlined_call_operand.hbm [shape: f32[384,128], index: 3, kind: input, shape index: {}]   ;;  %s579_s4 = inlined_call_operand.vmem [shape: f32[1,128], index: 4, kind: input, shape index: {}]   ;;  %s580_s5 = inlined_call_operand.hbm [shape: f32[2,128], index: 5, kind: output, shape index: {}]  }
   0x1   :  { %11 = vsyncpa [#allocation7], 0 }
   0x2   :  { %12 = vsyncpa [#allocation10], 0  ;;  %s31_s20 = sshll.u32 %s576_s1, 4  ;;  %s32_s20 = int_to_ptr.hbm [resolvable:$true] %s31_s20 }
   0x3   :  { %13 = vsyncpa [#allocation5], 0  ;;  %s515_s21 = smov [#allocation6]   ;;  %s18_s25 = sshll.u32 %s575_s0, 4  ;;  %s19_s25 = int_to_ptr.hbm [resolvable:$true] %s18_s25 }
   0x4   :  { %s33_s22 = sshll.u32 %s515_s21, 4  ;;  %s516_s26 = smov 384   ;;  %s34_s22 = int_to_ptr.vmem [resolvable:$true] %s33_s22 }
   0x5   :  { %s517_s27 = smov 24   ;;  %s518_s28 = smov [#allocation3]  }
   0x6   :  { %39 = dma.hbm_to_vmem [thread:$0]  %s32_s20, 6144, %s34_s22, [#allocation7], %s516_s26, %s516_s26, %s517_s27  }
   0x7   :  { %s20_s29 = sshll.u32 %s518_s28, 4  ;;  %s519_s30 = smov 32   ;;  %s21_s29 = int_to_ptr.vmem [resolvable:$true] %s20_s29 }
   0x8   :  { %s520_s6 = smov 2   ;;  %s45_s8 = sshll.u32 %s577_s2, 4  ;;  %s46_s8 = int_to_ptr.hbm [resolvable:$true] %s45_s8 }
   0x9   :  { %26 = dma.hbm_to_vmem [thread:$0]  %s19_s25, 64, %s21_s29, [#allocation4], %s519_s30, %s519_s30, %s520_s6  }
   0xa   :  { %s521_s9 = smov [#allocation8]   ;;  %s55_s12 = sshll.u32 %s578_s3, 4  ;;  %s56_s12 = int_to_ptr.hbm [resolvable:$true] %s55_s12 }
   0xb   :  { %s47_s10 = sshll.u32 %s521_s9, 4  ;;  %s522_s13 = smov [#allocation9]   ;;  %s48_s10 = int_to_ptr.vmem [resolvable:$true] %s47_s10 }
   0xc   :  { %50 = dma.hbm_to_vmem [thread:$0]  %s46_s8, 48, %s48_s10, [#allocation7]  }
   0xd   :  { %s57_s14 = sshll.u32 %s522_s13, 4  ;;  %s523_s15 = smov 128   ;;  %s58_s14 = int_to_ptr.vmem [resolvable:$true] %s57_s14 }
   0xe   :  { %s524_s16 = smov 8  }
   0xf   :  { %63 = dma.hbm_to_vmem [thread:$0]  %s56_s12, 6144, %s58_s14, [#allocation10], %s523_s15, %s523_s15, %s524_s16  }
  0x10   :  { %507 = dma.done.wait [#allocation4], 64  }
  0x11   :  { %508 = vsyncadd [#allocation4], 4294967232 }
  0x12   :  { %509 = dma.done.wait [#allocation7], 6192  }
  0x13   :  { %510 = vsyncadd [#allocation7], 4294961104 }
  0x14   :  { %511 = dma.done.wait [#allocation10], 6144  }
  0x15   :  { %512 = vsyncadd [#allocation10], 4294961152  ;;  %v525_v0 = vmov 0.0   ;;  %v162_v1 = vld [vmem:[#allocation6 + $0x168] sm:$0xff]  ;;  %v159_v2 = vld [vmem:[#allocation6 + $0x150] sm:$0xff]  ;;  %vm90_vm0 = vcmask 1041408  }
  0x16   :  { %86 = vst [vmem:[#allocation2] sm:$0x3] %v525_v0  ;;  %173 = vmatpush.msra.mxu0 %v162_v1  ;;  %v164_v3 = vld [vmem:[#allocation6 + $0x178] sm:$0xff]  ;;  %v161_v4 = vld [vmem:[#allocation6 + $0x160] sm:$0xff]  ;;  %v163_v6 = vld [vmem:[#allocation6 + $0x170] sm:$0xff]  ;;  %vm107_vm1 = vcmask 1041409  }
  0x17   :  { %v156_v5 = vld [vmem:[#allocation6 + $0x138] sm:$0xff]  ;;  %213 = vmatpush.msra.mxu2 %v164_v3  ;;  %193 = vmatpush.msra.mxu1 %v163_v6  ;;  %v158_v7 = vld [vmem:[#allocation6 + $0x148] sm:$0xff]  ;;  %v153_v9 = vld [vmem:[#allocation6 + $0x120] sm:$0xff]  ;;  %s526_s17 = smov [#allocation11]   ;;  %s356_s21 = sshll.u32 %s580_s5, 4  ;;  %s357_s21 = int_to_ptr.hbm [resolvable:$true] %s356_s21 }
  0x18   :  { %174 = vmatpush.msra.mxu0 %v159_v2  ;;  %v160_v8 = vld [vmem:[#allocation6 + $0x158] sm:$0xff]  ;;  %v157_v10 = vld [vmem:[#allocation6 + $0x140] sm:$0xff]  ;;  %v155_v11 = vld [vmem:[#allocation6 + $0x130] sm:$0xff]  ;;  %s354_s18 = sshll.u32 %s526_s17, 4  ;;  %s355_s18 = int_to_ptr.vmem [resolvable:$true] %s354_s18 }
  0x19   :  { %214 = vmatpush.msra.mxu2 %v161_v4  ;;  %194 = vmatpush.msra.mxu1 %v160_v8  ;;  %v150_v12 = vld [vmem:[#allocation6 + $0x108] sm:$0xff]  ;;  %v152_v14 = vld [vmem:[#allocation6 + $0x118] sm:$0xff]  ;;  %v147_v15 = vld [vmem:[#allocation6 + $0xf0] sm:$0xff] }
  0x1a   :  { %175 = vmatpush.msra.mxu0 %v156_v5  ;;  %v154_v13 = vld [vmem:[#allocation6 + $0x128] sm:$0xff]  ;;  %v151_v16 = vld [vmem:[#allocation6 + $0x110] sm:$0xff]  ;;  %v149_v17 = vld [vmem:[#allocation6 + $0x100] sm:$0xff] }
  0x1b   :  { %215 = vmatpush.msra.mxu2 %v158_v7  ;;  %195 = vmatpush.msra.mxu1 %v157_v10  ;;  %v144_v18 = vld [vmem:[#allocation6 + $0xd8] sm:$0xff]  ;;  %v146_v20 = vld [vmem:[#allocation6 + $0xe8] sm:$0xff]  ;;  %v141_v21 = vld [vmem:[#allocation6 + $0xc0] sm:$0xff] }
  0x1c   :  { %176 = vmatpush.msra.mxu0 %v153_v9  ;;  %v148_v19 = vld [vmem:[#allocation6 + $0xf8] sm:$0xff]  ;;  %v145_v22 = vld [vmem:[#allocation6 + $0xe0] sm:$0xff]  ;;  %v138_v23 = vld [vmem:[#allocation6 + $0xa8] sm:$0xff] }
  0x1d   :  { %216 = vmatpush.msra.mxu2 %v155_v11  ;;  %196 = vmatpush.msra.mxu1 %v154_v13  ;;  %v143_v24 = vld [vmem:[#allocation6 + $0xd0] sm:$0xff]  ;;  %v142_v25 = vld [vmem:[#allocation6 + $0xc8] sm:$0xff]  ;;  %v88_v26 = vld [vmem:[#allocation3] sm:$0x3] }
  0x1e   :  { %177 = vmatpush.msra.mxu0 %v150_v12  ;;  %v89_v27 = vld [vmem:[#allocation3 + $0x2] sm:$0x3]  ;;  %v91_v29 = vsel %vm90_vm0, %v88_v26, 0.0  ;;  %v135_v31 = vld [vmem:[#allocation6 + $0x90] sm:$0xff]  ;;  %v137_v35 = vld [vmem:[#allocation6 + $0xa0] sm:$0xff] }
  0x1f   :  { %217 = vmatpush.msra.mxu2 %v152_v14  ;;  %197 = vmatpush.msra.mxu1 %v151_v16  ;;  %v140_v28 = vld [vmem:[#allocation6 + $0xb8] sm:$0xff]  ;;  %v98_v30 = vsel %vm90_vm0, %v89_v27, 0.0  ;;  %v139_v32 = vld [vmem:[#allocation6 + $0xb0] sm:$0xff]  ;;  %v92_v33 = vrot.slane %v91_v29, 4  ;;  %v134_v42 = vld [vmem:[#allocation6 + $0x88] sm:$0xff] }
  0x20   :  { %178 = vmatpush.msra.mxu0 %v147_v15  ;;  %v99_v34 = vrot.slane %v98_v30, 4  ;;  %v251_v36 = vld [vmem:[#allocation9 + $0x78] sm:$0xff]  ;;  %v250_v37 = vld [vmem:[#allocation9 + $0x70] sm:$0xff]  ;;  %v249_v43 = vld [vmem:[#allocation9 + $0x68] sm:$0xff] }
  0x21   :  { %218 = vmatpush.msra.mxu2 %v149_v17  ;;  %198 = vmatpush.msra.mxu1 %v148_v19  ;;  %v132_v38 = vld [vmem:[#allocation6 + $0x78] sm:$0xff]  ;;  %v93_v40 = vadd.f32 %v92_v33, %v91_v29  ;;  %v129_v44 = vld [vmem:[#allocation6 + $0x60] sm:$0xff]  ;;  %v131_v48 = vld [vmem:[#allocation6 + $0x70] sm:$0xff] }
  0x22   :  { %179 = vmatpush.msra.mxu0 %v144_v18  ;;  %v136_v39 = vld [vmem:[#allocation6 + $0x98] sm:$0xff]  ;;  %v100_v41 = vadd.f32 %v99_v34, %v98_v30  ;;  %288 = vmatpush.msra.mxu3 %v251_v36  ;;  %v133_v45 = vld [vmem:[#allocation6 + $0x80] sm:$0xff]  ;;  %v126_v50 = vld [vmem:[#allocation6 + $0x48] sm:$0xff] }
  0x23   :  { %219 = vmatpush.msra.mxu2 %v146_v20  ;;  %199 = vmatpush.msra.mxu1 %v145_v22  ;;  %v94_v46 = vrot.slane %v93_v40, 2  ;;  %v248_v49 = vld [vmem:[#allocation9 + $0x60] sm:$0xff]  ;;  %v128_v54 = vld [vmem:[#allocation6 + $0x58] sm:$0xff]  ;;  %v123_v56 = vld [vmem:[#allocation6 + $0x30] sm:$0xff] }
  0x24   :  { %180 = vmatpush.msra.mxu0 %v141_v21  ;;  %v101_v47 = vrot.slane %v100_v41, 2  ;;  %289 = vmatpush.msra.mxu3 %v250_v37  ;;  %v130_v51 = vld [vmem:[#allocation6 + $0x68] sm:$0xff]  ;;  %v247_v55 = vld [vmem:[#allocation9 + $0x58] sm:$0xff]  ;;  %v127_v59 = vld [vmem:[#allocation6 + $0x50] sm:$0xff] }
  0x25   :  { %220 = vmatpush.msra.mxu2 %v143_v24  ;;  %200 = vmatpush.msra.mxu1 %v142_v25  ;;  %v95_v52 = vadd.f32 %v94_v46, %v93_v40  ;;  %v125_v60 = vld [vmem:[#allocation6 + $0x40] sm:$0xff]  ;;  %v246_v61 = vld [vmem:[#allocation9 + $0x50] sm:$0xff]  ;;  %v122_v3 = vld [vmem:[#allocation6 + $0x28] sm:$0xff] }
  0x26   :  { %181 = vmatpush.msra.mxu0 %v138_v23  ;;  %v102_v53 = vadd.f32 %v101_v47, %v100_v41  ;;  %290 = vmatpush.msra.mxu3 %v249_v43  ;;  %v120_v62 = vld [vmem:[#allocation6 + $0x18] sm:$0xff]  ;;  %v245_v4 = vld [vmem:[#allocation9 + $0x48] sm:$0xff]  ;;  %v117_v5 = vld [vmem:[#allocation6] sm:$0xff] }
  0x27   :  { %221 = vmatpush.msra.mxu2 %v140_v28  ;;  %201 = vmatpush.msra.mxu1 %v139_v32  ;;  %v96_v57 = vrot.slane %v95_v52, 1  ;;  %v87_v63 = vld [vmem:[#allocation2] sm:$0x3]  ;;  %v121_v7 = vld [vmem:[#allocation6 + $0x20] sm:$0xff]  ;;  %v119_v9 = vld [vmem:[#allocation6 + $0x10] sm:$0xff] }
  0x28   :  { %182 = vmatpush.msra.mxu0 %v135_v31  ;;  %v103_v58 = vrot.slane %v102_v53, 1  ;;  %291 = vmatpush.msra.mxu3 %v248_v49  ;;  %v124_v2 = vld [vmem:[#allocation6 + $0x38] sm:$0xff]  ;;  %v118_v11 = vld [vmem:[#allocation6 + $0x8] sm:$0xff] }
  0x29   :  { %222 = vmatpush.msra.mxu2 %v137_v35  ;;  %202 = vmatpush.msra.mxu1 %v136_v39  ;;  %v97_v0 = vadd.f32 %v96_v57, %v95_v52  ;;  %v267_v10 = vld [vmem:[#allocation9 + $0xf8] sm:$0xff]  ;;  %v244_v12 = vld [vmem:[#allocation9 + $0x40] sm:$0xff]  ;;  %v266_v13 = vld [vmem:[#allocation9 + $0xf0] sm:$0xff] }
  0x2a   :  { %183 = vmatpush.msra.mxu0 %v132_v38  ;;  %v104_v1 = vadd.f32 %v103_v58, %v102_v53  ;;  %292 = vmatpush.msra.mxu3 %v247_v55  ;;  %v283_v14 = vld [vmem:[#allocation9 + $0x178] sm:$0xff]  ;;  %v265_v16 = vld [vmem:[#allocation9 + $0xe8] sm:$0xff]  ;;  %v282_v17 = vld [vmem:[#allocation9 + $0x170] sm:$0xff] }
  0x2b   :  { %223 = vmatpush.msra.mxu2 %v134_v42  ;;  %203 = vmatpush.msra.mxu1 %v133_v45  ;;  %v243_v15 = vld [vmem:[#allocation9 + $0x38] sm:$0xff]  ;;  %v242_v18 = vld [vmem:[#allocation9 + $0x30] sm:$0xff]  ;;  %v264_v19 = vld [vmem:[#allocation9 + $0xe0] sm:$0xff] }
  0x2c   :  { %184 = vmatpush.msra.mxu0 %v129_v44  ;;  %v108_v6 = vsel %vm107_vm1, %v104_v1, %v97_v0  ;;  %293 = vmatpush.msra.mxu3 %v246_v61  ;;  %v281_v20 = vld [vmem:[#allocation9 + $0x168] sm:$0xff]  ;;  %v263_v22 = vld [vmem:[#allocation9 + $0xd8] sm:$0xff]  ;;  %v280_v23 = vld [vmem:[#allocation9 + $0x160] sm:$0xff] }
  0x2d   :  { %224 = vmatpush.msra.mxu2 %v131_v48  ;;  %204 = vmatpush.msra.mxu1 %v130_v51  ;;  %v110_v8 = vadd.f32 %v108_v6, %v87_v63  ;;  %v241_v21 = vld [vmem:[#allocation9 + $0x28] sm:$0xff]  ;;  %v262_v26 = vld [vmem:[#allocation9 + $0xd0] sm:$0xff]  ;;  %v279_v27 = vld [vmem:[#allocation9 + $0x158] sm:$0xff] }
  0x2e   :  { %185 = vmatpush.msra.mxu0 %v126_v50  ;;  %294 = vmatpush.msra.mxu3 %v245_v4  ;;  %v261_v28 = vld [vmem:[#allocation9 + $0xc8] sm:$0xff]  ;;  %v278_v29 = vld [vmem:[#allocation9 + $0x150] sm:$0xff]  ;;  %v240_v30 = vld [vmem:[#allocation9 + $0x20] sm:$0xff] }
  0x2f   :  { %225 = vmatpush.msra.mxu2 %v128_v54  ;;  %205 = vmatpush.msra.mxu1 %v127_v59  ;;  %111 = vst [vmem:[#allocation2] sm:$0x3] %v110_v8  ;;  %v260_v31 = vld [vmem:[#allocation9 + $0xc0] sm:$0xff]  ;;  %v277_v32 = vld [vmem:[#allocation9 + $0x148] sm:$0xff]  ;;  %v239_v33 = vld [vmem:[#allocation9 + $0x18] sm:$0xff] }
  0x30   :  { %186 = vmatpush.msra.mxu0 %v123_v56  ;;  %295 = vmatpush.msra.mxu3 %v244_v12  ;;  %v259_v34 = vld [vmem:[#allocation9 + $0xb8] sm:$0xff]  ;;  %v276_v35 = vld [vmem:[#allocation9 + $0x140] sm:$0xff]  ;;  %v238_v36 = vld [vmem:[#allocation9 + $0x10] sm:$0xff] }
  0x31   :  { %226 = vmatpush.msra.mxu2 %v125_v60  ;;  %206 = vmatpush.msra.mxu1 %v124_v2  ;;  %v258_v37 = vld [vmem:[#allocation9 + $0xb0] sm:$0xff]  ;;  %v275_v38 = vld [vmem:[#allocation9 + $0x138] sm:$0xff]  ;;  %v237_v39 = vld [vmem:[#allocation9 + $0x8] sm:$0xff] }
  0x32   :  { %187 = vmatpush.msra.mxu0 %v120_v62  ;;  %296 = vmatpush.msra.mxu3 %v243_v15  ;;  %v257_v40 = vld [vmem:[#allocation9 + $0xa8] sm:$0xff]  ;;  %v274_v41 = vld [vmem:[#allocation9 + $0x130] sm:$0xff]  ;;  %v236_v42 = vld [vmem:[#allocation9] sm:$0xff] }
  0x33   :  { %227 = vmatpush.msra.mxu2 %v122_v3  ;;  %207 = vmatpush.msra.mxu1 %v121_v7  ;;  %v256_v43 = vld [vmem:[#allocation9 + $0xa0] sm:$0xff]  ;;  %v273_v44 = vld [vmem:[#allocation9 + $0x128] sm:$0xff]  ;;  %v255_v45 = vld [vmem:[#allocation9 + $0x98] sm:$0xff] }
  0x34   :  { %188 = vmatpush.msra.mxu0 %v117_v5  ;;  %297 = vmatpush.msra.mxu3 %v242_v18  ;;  %v272_v46 = vld [vmem:[#allocation9 + $0x120] sm:$0xff]  ;;  %v254_v47 = vld [vmem:[#allocation9 + $0x90] sm:$0xff]  ;;  %v271_v48 = vld [vmem:[#allocation9 + $0x118] sm:$0xff] }
  0x35   :  { %228 = vmatpush.msra.mxu2 %v119_v9  ;;  %208 = vmatpush.msra.mxu1 %v118_v11  ;;  %v253_v49 = vld [vmem:[#allocation9 + $0x88] sm:$0xff]  ;;  %v270_v50 = vld [vmem:[#allocation9 + $0x110] sm:$0xff]  ;;  %v252_v51 = vld [vmem:[#allocation9 + $0x80] sm:$0xff] }
  0x36   :  { %308 = vmatpush.msrb.mxu0 %v267_v10  ;;  %v115_v24 = vld [vmem:[#allocation2] sm:$0x3]  ;;  %298 = vmatpush.msra.mxu3 %v241_v21  ;;  %v269_v52 = vld [vmem:[#allocation9 + $0x108] sm:$0xff]  ;;  %v268_v53 = vld [vmem:[#allocation9 + $0x100] sm:$0xff] }
  0x37   :  { %328 = vmatpush.msrb.mxu1 %v283_v14  ;;  %v116_v25 = vmul.f32 0.125, %v115_v24  ;;  %v165_v54 = vld [vmem:[#allocation8] sm:$0x7]  ;;  %v380_v3 = vld [vmem:[%s579_s4] ss:$0 sm:$0xff] }
  0x38   :  { %309 = vmatpush.msrb.mxu0 %v266_v13  ;;  %299 = vmatpush.msra.mxu3 %v240_v30  ;;  %v167_v55 = vperm.slane %v165_v54, 0  ;;  %v168_v56 = vperm.slane %v165_v54, 1  ;;  %v169_v61 = vperm.slane %v165_v54, 2 }
  0x39   :  { %329 = vmatpush.msrb.mxu1 %v282_v17  ;;  %189 = vmatmul.f32.vlgmr.msra.gmra.mxu0 %v116_v25 }
  0x3a   :  { %310 = vmatpush.msrb.mxu0 %v265_v16  ;;  %229 = vmatmul.f32.vlgmr.msra.gmra.mxu2 %v116_v25 }
  0x3b   :  { %330 = vmatpush.msrb.mxu1 %v281_v20  ;;  %300 = vmatpush.msra.mxu3 %v239_v33 }
  0x3c   :  { %311 = vmatpush.msrb.mxu0 %v264_v19  ;;  %209 = vmatmul.f32.vlgmr.msra.gmra.mxu1 %v116_v25 }
  0x3d   :  { %331 = vmatpush.msrb.mxu1 %v280_v23  ;;  %301 = vmatpush.msra.mxu3 %v238_v36 }
  0x3e   :  { %312 = vmatpush.msrb.mxu0 %v263_v22 }
  0x3f   :  { %332 = vmatpush.msrb.mxu1 %v279_v27  ;;  %302 = vmatpush.msra.mxu3 %v237_v39 }
  0x40   :  { %313 = vmatpush.msrb.mxu0 %v262_v26 }
  0x41   :  { %333 = vmatpush.msrb.mxu1 %v278_v29  ;;  %303 = vmatpush.msra.mxu3 %v236_v42 }
  0x42   :  { %314 = vmatpush.msrb.mxu0 %v261_v28 }
  0x43   :  { %334 = vmatpush.msrb.mxu1 %v277_v32 }
  0x44   :  { %315 = vmatpush.msrb.mxu0 %v260_v31 }
  0x45   :  { %335 = vmatpush.msrb.mxu1 %v276_v35 }
  0x46   :  { %316 = vmatpush.msrb.mxu0 %v259_v34 }
  0x47   :  { %336 = vmatpush.msrb.mxu1 %v275_v38 }
  0x48   :  { %317 = vmatpush.msrb.mxu0 %v258_v37 }
  0x49   :  { %337 = vmatpush.msrb.mxu1 %v274_v41 }
  0x4a   :  { %318 = vmatpush.msrb.mxu0 %v257_v40 }
  0x4b   :  { %338 = vmatpush.msrb.mxu1 %v273_v44 }
  0x4c   :  { %319 = vmatpush.msrb.mxu0 %v256_v43 }
  0x4d   :  { %339 = vmatpush.msrb.mxu1 %v272_v46 }
  0x4e   :  { %320 = vmatpush.msrb.mxu0 %v255_v45 }
  0x4f   :  { %340 = vmatpush.msrb.mxu1 %v271_v48 }
  0x50   :  { %321 = vmatpush.msrb.mxu0 %v254_v47 }
  0x51   :  { %341 = vmatpush.msrb.mxu1 %v270_v50 }
  0x52   :  { %322 = vmatpush.msrb.mxu0 %v253_v49 }
  0x53   :  { %342 = vmatpush.msrb.mxu1 %v269_v52 }
  0x54   :  { %323 = vmatpush.msrb.mxu0 %v252_v51 }
  0x55   :  { %343 = vmatpush.msrb.mxu1 %v268_v53 }
  0xb6   :  { %v190_v57 = vpop.f32.mrf.mxu0 }
  0xb7   :  { %v191_v58 = vadd.f32 %v190_v57, %v167_v55 }
  0xb9   :  { %v210_v59 = vpop.f32.mrf.mxu1  ;;  %381 = vtanh.f32 %v191_v58 }
  0xba   :  { %v211_v60 = vadd.f32 %v210_v59, %v168_v56 }
  0xbc   :  { %383 = vtanh.f32 %v211_v60 }
  0xbd   :  { %v230_v62 = vpop.f32.mrf.mxu2 }
  0xbe   :  { %v231_v63 = vadd.f32 %v230_v62, %v169_v61 }
  0xbf   :  { %v382_v0 = vpop.eup %381 }
  0xc0   :  { %385 = vtanh.f32 %v231_v63  ;;  %304 = vmatmul.f32.vlgmr.msra.gmra.mxu3 %v382_v0 }
  0xc2   :  { %v384_v1 = vpop.eup %383 }
  0xc3   :  { %324 = vmatmul.f32.vlgmr.msrb.gmra.mxu0 %v384_v1 }
  0xc6   :  { %v386_v2 = vpop.eup %385 }
  0xc7   :  { %344 = vmatmul.f32.vlgmr.msrb.gmra.mxu1 %v386_v2 }
 0x140   :  { %v325_v5 = vpop.f32.mrf.mxu0 }
 0x143   :  { %v305_v4 = vpop.f32.mrf.mxu3 }
 0x144   :  { %v306_v6 = vadd.f32 %v380_v3, %v305_v4  ;;  %v345_v7 = vpop.f32.mrf.mxu1 }
 0x146   :  { %v326_v8 = vadd.f32 %v325_v5, %v306_v6 }
 0x148   :  { %v346_v9 = vadd.f32 %v345_v7, %v326_v8 }
 0x14a   :  { %348 = vst [vmem:[#allocation11] sm:$0x3] %v346_v9 }
 0x14b   :  { %359 = dma.vmem_to_hbm [thread:$0]  %s355_s18, 32, %s357_s21, [#allocation5]  }
 0x14c   :  { %513 = dma.done.wait [#allocation5], 32  }
 0x14d   :  { %514 = vsyncadd [#allocation5], 4294967264 }
 0x14e   :  { %364 = vsyncpa [#allocation4], 1 }
 0x14f   :  { %365 = vsyncpa [#allocation7], 1 }
 0x150   :  { %366 = vsyncpa [#allocation10], 1 }
 0x151   :  { %367 = vsyncpa [#allocation5], 1 }

// kernel: tpu_custom_call.1
= control target key start
LH: loop header
LB: loop body
LE: loop exit
PB: predicated region body
PF: predicated region fallthrough
CT: control target
= control target key end

     0   :  { %10 = vsyncpa [#allocation4], 0  ;;  %s575_s0 = inlined_call_operand.hbm [shape: f32[2,2,128], index: 0, kind: input, shape index: {}]   ;;  %s576_s1 = inlined_call_operand.hbm [shape: f32[128,384], index: 1, kind: input, shape index: {}]   ;;  %s577_s2 = inlined_call_operand.hbm [shape: f32[1,384], index: 2, kind: input, shape index: {}]   ;;  %s578_s3 = inlined_call_operand.hbm [shape: f32[384,128], index: 3, kind: input, shape index: {}]   ;;  %s579_s4 = inlined_call_operand.vmem [shape: f32[1,128], index: 4, kind: input, shape index: {}]   ;;  %s580_s5 = inlined_call_operand.hbm [shape: f32[2,128], index: 5, kind: output, shape index: {}]  }
   0x1   :  { %11 = vsyncpa [#allocation7], 0 }
   0x2   :  { %12 = vsyncpa [#allocation10], 0  ;;  %s31_s20 = sshll.u32 %s576_s1, 4  ;;  %s32_s20 = int_to_ptr.hbm [resolvable:$true] %s31_s20 }
   0x3   :  { %13 = vsyncpa [#allocation5], 0  ;;  %s515_s21 = smov [#allocation6]   ;;  %s18_s25 = sshll.u32 %s575_s0, 4  ;;  %s19_s25 = int_to_ptr.hbm [resolvable:$true] %s18_s25 }
   0x4   :  { %s33_s22 = sshll.u32 %s515_s21, 4  ;;  %s516_s26 = smov 384   ;;  %s34_s22 = int_to_ptr.vmem [resolvable:$true] %s33_s22 }
   0x5   :  { %s517_s27 = smov 24   ;;  %s518_s28 = smov [#allocation3]  }
   0x6   :  { %39 = dma.hbm_to_vmem [thread:$0]  %s32_s20, 6144, %s34_s22, [#allocation7], %s516_s26, %s516_s26, %s517_s27  }
   0x7   :  { %s20_s29 = sshll.u32 %s518_s28, 4  ;;  %s519_s30 = smov 32   ;;  %s21_s29 = int_to_ptr.vmem [resolvable:$true] %s20_s29 }
   0x8   :  { %s520_s6 = smov 2   ;;  %s45_s8 = sshll.u32 %s577_s2, 4  ;;  %s46_s8 = int_to_ptr.hbm [resolvable:$true] %s45_s8 }
   0x9   :  { %26 = dma.hbm_to_vmem [thread:$0]  %s19_s25, 64, %s21_s29, [#allocation4], %s519_s30, %s519_s30, %s520_s6  }
   0xa   :  { %s521_s9 = smov [#allocation8]   ;;  %s55_s12 = sshll.u32 %s578_s3, 4  ;;  %s56_s12 = int_to_ptr.hbm [resolvable:$true] %s55_s12 }
   0xb   :  { %s47_s10 = sshll.u32 %s521_s9, 4  ;;  %s522_s13 = smov [#allocation9]   ;;  %s48_s10 = int_to_ptr.vmem [resolvable:$true] %s47_s10 }
   0xc   :  { %50 = dma.hbm_to_vmem [thread:$0]  %s46_s8, 48, %s48_s10, [#allocation7]  }
   0xd   :  { %s57_s14 = sshll.u32 %s522_s13, 4  ;;  %s523_s15 = smov 128   ;;  %s58_s14 = int_to_ptr.vmem [resolvable:$true] %s57_s14 }
   0xe   :  { %s524_s16 = smov 8  }
   0xf   :  { %63 = dma.hbm_to_vmem [thread:$0]  %s56_s12, 6144, %s58_s14, [#allocation10], %s523_s15, %s523_s15, %s524_s16  }
  0x10   :  { %507 = dma.done.wait [#allocation4], 64  }
  0x11   :  { %508 = vsyncadd [#allocation4], 4294967232 }
  0x12   :  { %509 = dma.done.wait [#allocation7], 6192  }
  0x13   :  { %510 = vsyncadd [#allocation7], 4294961104 }
  0x14   :  { %511 = dma.done.wait [#allocation10], 6144  }
  0x15   :  { %512 = vsyncadd [#allocation10], 4294961152  ;;  %v525_v0 = vmov 0.0   ;;  %v162_v1 = vld [vmem:[#allocation6 + $0x168] sm:$0xff]  ;;  %v159_v2 = vld [vmem:[#allocation6 + $0x150] sm:$0xff]  ;;  %vm90_vm0 = vcmask 1041408  }
  0x16   :  { %86 = vst [vmem:[#allocation2] sm:$0x3] %v525_v0  ;;  %173 = vmatpush.msra.mxu0 %v162_v1  ;;  %v164_v3 = vld [vmem:[#allocation6 + $0x178] sm:$0xff]  ;;  %v161_v4 = vld [vmem:[#allocation6 + $0x160] sm:$0xff]  ;;  %v163_v6 = vld [vmem:[#allocation6 + $0x170] sm:$0xff]  ;;  %vm107_vm1 = vcmask 1041409  }
  0x17   :  { %v156_v5 = vld [vmem:[#allocation6 + $0x138] sm:$0xff]  ;;  %213 = vmatpush.msra.mxu2 %v164_v3  ;;  %193 = vmatpush.msra.mxu1 %v163_v6  ;;  %v158_v7 = vld [vmem:[#allocation6 + $0x148] sm:$0xff]  ;;  %v153_v9 = vld [vmem:[#allocation6 + $0x120] sm:$0xff]  ;;  %s526_s17 = smov [#allocation11]   ;;  %s356_s21 = sshll.u32 %s580_s5, 4  ;;  %s357_s21 = int_to_ptr.hbm [resolvable:$true] %s356_s21 }
  0x18   :  { %174 = vmatpush.msra.mxu0 %v159_v2  ;;  %v160_v8 = vld [vmem:[#allocation6 + $0x158] sm:$0xff]  ;;  %v157_v10 = vld [vmem:[#allocation6 + $0x140] sm:$0xff]  ;;  %v155_v11 = vld [vmem:[#allocation6 + $0x130] sm:$0xff]  ;;  %s354_s18 = sshll.u32 %s526_s17, 4  ;;  %s355_s18 = int_to_ptr.vmem [resolvable:$true] %s354_s18 }
  0x19   :  { %214 = vmatpush.msra.mxu2 %v161_v4  ;;  %194 = vmatpush.msra.mxu1 %v160_v8  ;;  %v150_v12 = vld [vmem:[#allocation6 + $0x108] sm:$0xff]  ;;  %v152_v14 = vld [vmem:[#allocation6 + $0x118] sm:$0xff]  ;;  %v147_v15 = vld [vmem:[#allocation6 + $0xf0] sm:$0xff] }
  0x1a   :  { %175 = vmatpush.msra.mxu0 %v156_v5  ;;  %v154_v13 = vld [vmem:[#allocation6 + $0x128] sm:$0xff]  ;;  %v151_v16 = vld [vmem:[#allocation6 + $0x110] sm:$0xff]  ;;  %v149_v17 = vld [vmem:[#allocation6 + $0x100] sm:$0xff] }
  0x1b   :  { %215 = vmatpush.msra.mxu2 %v158_v7  ;;  %195 = vmatpush.msra.mxu1 %v157_v10  ;;  %v144_v18 = vld [vmem:[#allocation6 + $0xd8] sm:$0xff]  ;;  %v146_v20 = vld [vmem:[#allocation6 + $0xe8] sm:$0xff]  ;;  %v141_v21 = vld [vmem:[#allocation6 + $0xc0] sm:$0xff] }
  0x1c   :  { %176 = vmatpush.msra.mxu0 %v153_v9  ;;  %v148_v19 = vld [vmem:[#allocation6 + $0xf8] sm:$0xff]  ;;  %v145_v22 = vld [vmem:[#allocation6 + $0xe0] sm:$0xff]  ;;  %v138_v23 = vld [vmem:[#allocation6 + $0xa8] sm:$0xff] }
  0x1d   :  { %216 = vmatpush.msra.mxu2 %v155_v11  ;;  %196 = vmatpush.msra.mxu1 %v154_v13  ;;  %v143_v24 = vld [vmem:[#allocation6 + $0xd0] sm:$0xff]  ;;  %v142_v25 = vld [vmem:[#allocation6 + $0xc8] sm:$0xff]  ;;  %v88_v26 = vld [vmem:[#allocation3] sm:$0x3] }
  0x1e   :  { %177 = vmatpush.msra.mxu0 %v150_v12  ;;  %v89_v27 = vld [vmem:[#allocation3 + $0x2] sm:$0x3]  ;;  %v91_v29 = vsel %vm90_vm0, %v88_v26, 0.0  ;;  %v135_v31 = vld [vmem:[#allocation6 + $0x90] sm:$0xff]  ;;  %v137_v35 = vld [vmem:[#allocation6 + $0xa0] sm:$0xff] }
  0x1f   :  { %217 = vmatpush.msra.mxu2 %v152_v14  ;;  %197 = vmatpush.msra.mxu1 %v151_v16  ;;  %v140_v28 = vld [vmem:[#allocation6 + $0xb8] sm:$0xff]  ;;  %v98_v30 = vsel %vm90_vm0, %v89_v27, 0.0  ;;  %v139_v32 = vld [vmem:[#allocation6 + $0xb0] sm:$0xff]  ;;  %v92_v33 = vrot.slane %v91_v29, 4  ;;  %v134_v42 = vld [vmem:[#allocation6 + $0x88] sm:$0xff] }
  0x20   :  { %178 = vmatpush.msra.mxu0 %v147_v15  ;;  %v99_v34 = vrot.slane %v98_v30, 4  ;;  %v251_v36 = vld [vmem:[#allocation9 + $0x78] sm:$0xff]  ;;  %v250_v37 = vld [vmem:[#allocation9 + $0x70] sm:$0xff]  ;;  %v249_v43 = vld [vmem:[#allocation9 + $0x68] sm:$0xff] }
  0x21   :  { %218 = vmatpush.msra.mxu2 %v149_v17  ;;  %198 = vmatpush.msra.mxu1 %v148_v19  ;;  %v132_v38 = vld [vmem:[#allocation6 + $0x78] sm:$0xff]  ;;  %v93_v40 = vadd.f32 %v92_v33, %v91_v29  ;;  %v129_v44 = vld [vmem:[#allocation6 + $0x60] sm:$0xff]  ;;  %v131_v48 = vld [vmem:[#allocation6 + $0x70] sm:$0xff] }
  0x22   :  { %179 = vmatpush.msra.mxu0 %v144_v18  ;;  %v136_v39 = vld [vmem:[#allocation6 + $0x98] sm:$0xff]  ;;  %v100_v41 = vadd.f32 %v99_v34, %v98_v30  ;;  %288 = vmatpush.msra.mxu3 %v251_v36  ;;  %v133_v45 = vld [vmem:[#allocation6 + $0x80] sm:$0xff]  ;;  %v126_v50 = vld [vmem:[#allocation6 + $0x48] sm:$0xff] }
  0x23   :  { %219 = vmatpush.msra.mxu2 %v146_v20  ;;  %199 = vmatpush.msra.mxu1 %v145_v22  ;;  %v94_v46 = vrot.slane %v93_v40, 2  ;;  %v248_v49 = vld [vmem:[#allocation9 + $0x60] sm:$0xff]  ;;  %v128_v54 = vld [vmem:[#allocation6 + $0x58] sm:$0xff]  ;;  %v123_v56 = vld [vmem:[#allocation6 + $0x30] sm:$0xff] }
  0x24   :  { %180 = vmatpush.msra.mxu0 %v141_v21  ;;  %v101_v47 = vrot.slane %v100_v41, 2  ;;  %289 = vmatpush.msra.mxu3 %v250_v37  ;;  %v130_v51 = vld [vmem:[#allocation6 + $0x68] sm:$0xff]  ;;  %v247_v55 = vld [vmem:[#allocation9 + $0x58] sm:$0xff]  ;;  %v127_v59 = vld [vmem:[#allocation6 + $0x50] sm:$0xff] }
  0x25   :  { %220 = vmatpush.msra.mxu2 %v143_v24  ;;  %200 = vmatpush.msra.mxu1 %v142_v25  ;;  %v95_v52 = vadd.f32 %v94_v46, %v93_v40  ;;  %v125_v60 = vld [vmem:[#allocation6 + $0x40] sm:$0xff]  ;;  %v246_v61 = vld [vmem:[#allocation9 + $0x50] sm:$0xff]  ;;  %v122_v3 = vld [vmem:[#allocation6 + $0x28] sm:$0xff] }
  0x26   :  { %181 = vmatpush.msra.mxu0 %v138_v23  ;;  %v102_v53 = vadd.f32 %v101_v47, %v100_v41  ;;  %290 = vmatpush.msra.mxu3 %v249_v43  ;;  %v120_v62 = vld [vmem:[#allocation6 + $0x18] sm:$0xff]  ;;  %v245_v4 = vld [vmem:[#allocation9 + $0x48] sm:$0xff]  ;;  %v117_v5 = vld [vmem:[#allocation6] sm:$0xff] }
  0x27   :  { %221 = vmatpush.msra.mxu2 %v140_v28  ;;  %201 = vmatpush.msra.mxu1 %v139_v32  ;;  %v96_v57 = vrot.slane %v95_v52, 1  ;;  %v87_v63 = vld [vmem:[#allocation2] sm:$0x3]  ;;  %v121_v7 = vld [vmem:[#allocation6 + $0x20] sm:$0xff]  ;;  %v119_v9 = vld [vmem:[#allocation6 + $0x10] sm:$0xff] }
  0x28   :  { %182 = vmatpush.msra.mxu0 %v135_v31  ;;  %v103_v58 = vrot.slane %v102_v53, 1  ;;  %291 = vmatpush.msra.mxu3 %v248_v49  ;;  %v124_v2 = vld [vmem:[#allocation6 + $0x38] sm:$0xff]  ;;  %v118_v11 = vld [vmem:[#allocation6 + $0x8] sm:$0xff] }
  0x29   :  { %222 = vmatpush.msra.mxu2 %v137_v35  ;;  %202 = vmatpush.msra.mxu1 %v136_v39  ;;  %v97_v0 = vadd.f32 %v96_v57, %v95_v52  ;;  %v267_v10 = vld [vmem:[#allocation9 + $0xf8] sm:$0xff]  ;;  %v244_v12 = vld [vmem:[#allocation9 + $0x40] sm:$0xff]  ;;  %v266_v13 = vld [vmem:[#allocation9 + $0xf0] sm:$0xff] }
  0x2a   :  { %183 = vmatpush.msra.mxu0 %v132_v38  ;;  %v104_v1 = vadd.f32 %v103_v58, %v102_v53  ;;  %292 = vmatpush.msra.mxu3 %v247_v55  ;;  %v283_v14 = vld [vmem:[#allocation9 + $0x178] sm:$0xff]  ;;  %v265_v16 = vld [vmem:[#allocation9 + $0xe8] sm:$0xff]  ;;  %v282_v17 = vld [vmem:[#allocation9 + $0x170] sm:$0xff] }
  0x2b   :  { %223 = vmatpush.msra.mxu2 %v134_v42  ;;  %203 = vmatpush.msra.mxu1 %v133_v45  ;;  %v243_v15 = vld [vmem:[#allocation9 + $0x38] sm:$0xff]  ;;  %v242_v18 = vld [vmem:[#allocation9 + $0x30] sm:$0xff]  ;;  %v264_v19 = vld [vmem:[#allocation9 + $0xe0] sm:$0xff] }
  0x2c   :  { %184 = vmatpush.msra.mxu0 %v129_v44  ;;  %v108_v6 = vsel %vm107_vm1, %v104_v1, %v97_v0  ;;  %293 = vmatpush.msra.mxu3 %v246_v61  ;;  %v281_v20 = vld [vmem:[#allocation9 + $0x168] sm:$0xff]  ;;  %v263_v22 = vld [vmem:[#allocation9 + $0xd8] sm:$0xff]  ;;  %v280_v23 = vld [vmem:[#allocation9 + $0x160] sm:$0xff] }
  0x2d   :  { %224 = vmatpush.msra.mxu2 %v131_v48  ;;  %204 = vmatpush.msra.mxu1 %v130_v51  ;;  %v110_v8 = vadd.f32 %v108_v6, %v87_v63  ;;  %v241_v21 = vld [vmem:[#allocation9 + $0x28] sm:$0xff]  ;;  %v262_v26 = vld [vmem:[#allocation9 + $0xd0] sm:$0xff]  ;;  %v279_v27 = vld [vmem:[#allocation9 + $0x158] sm:$0xff] }
  0x2e   :  { %185 = vmatpush.msra.mxu0 %v126_v50  ;;  %294 = vmatpush.msra.mxu3 %v245_v4  ;;  %v261_v28 = vld [vmem:[#allocation9 + $0xc8] sm:$0xff]  ;;  %v278_v29 = vld [vmem:[#allocation9 + $0x150] sm:$0xff]  ;;  %v240_v30 = vld [vmem:[#allocation9 + $0x20] sm:$0xff] }
  0x2f   :  { %225 = vmatpush.msra.mxu2 %v128_v54  ;;  %205 = vmatpush.msra.mxu1 %v127_v59  ;;  %111 = vst [vmem:[#allocation2] sm:$0x3] %v110_v8  ;;  %v260_v31 = vld [vmem:[#allocation9 + $0xc0] sm:$0xff]  ;;  %v277_v32 = vld [vmem:[#allocation9 + $0x148] sm:$0xff]  ;;  %v239_v33 = vld [vmem:[#allocation9 + $0x18] sm:$0xff] }
  0x30   :  { %186 = vmatpush.msra.mxu0 %v123_v56  ;;  %295 = vmatpush.msra.mxu3 %v244_v12  ;;  %v259_v34 = vld [vmem:[#allocation9 + $0xb8] sm:$0xff]  ;;  %v276_v35 = vld [vmem:[#allocation9 + $0x140] sm:$0xff]  ;;  %v238_v36 = vld [vmem:[#allocation9 + $0x10] sm:$0xff] }
  0x31   :  { %226 = vmatpush.msra.mxu2 %v125_v60  ;;  %206 = vmatpush.msra.mxu1 %v124_v2  ;;  %v258_v37 = vld [vmem:[#allocation9 + $0xb0] sm:$0xff]  ;;  %v275_v38 = vld [vmem:[#allocation9 + $0x138] sm:$0xff]  ;;  %v237_v39 = vld [vmem:[#allocation9 + $0x8] sm:$0xff] }
  0x32   :  { %187 = vmatpush.msra.mxu0 %v120_v62  ;;  %296 = vmatpush.msra.mxu3 %v243_v15  ;;  %v257_v40 = vld [vmem:[#allocation9 + $0xa8] sm:$0xff]  ;;  %v274_v41 = vld [vmem:[#allocation9 + $0x130] sm:$0xff]  ;;  %v236_v42 = vld [vmem:[#allocation9] sm:$0xff] }
  0x33   :  { %227 = vmatpush.msra.mxu2 %v122_v3  ;;  %207 = vmatpush.msra.mxu1 %v121_v7  ;;  %v256_v43 = vld [vmem:[#allocation9 + $0xa0] sm:$0xff]  ;;  %v273_v44 = vld [vmem:[#allocation9 + $0x128] sm:$0xff]  ;;  %v255_v45 = vld [vmem:[#allocation9 + $0x98] sm:$0xff] }
  0x34   :  { %188 = vmatpush.msra.mxu0 %v117_v5  ;;  %297 = vmatpush.msra.mxu3 %v242_v18  ;;  %v272_v46 = vld [vmem:[#allocation9 + $0x120] sm:$0xff]  ;;  %v254_v47 = vld [vmem:[#allocation9 + $0x90] sm:$0xff]  ;;  %v271_v48 = vld [vmem:[#allocation9 + $0x118] sm:$0xff] }
  0x35   :  { %228 = vmatpush.msra.mxu2 %v119_v9  ;;  %208 = vmatpush.msra.mxu1 %v118_v11  ;;  %v253_v49 = vld [vmem:[#allocation9 + $0x88] sm:$0xff]  ;;  %v270_v50 = vld [vmem:[#allocation9 + $0x110] sm:$0xff]  ;;  %v252_v51 = vld [vmem:[#allocation9 + $0x80] sm:$0xff] }
  0x36   :  { %308 = vmatpush.msrb.mxu0 %v267_v10  ;;  %v115_v24 = vld [vmem:[#allocation2] sm:$0x3]  ;;  %298 = vmatpush.msra.mxu3 %v241_v21  ;;  %v269_v52 = vld [vmem:[#allocation9 + $0x108] sm:$0xff]  ;;  %v268_v53 = vld [vmem:[#allocation9 + $0x100] sm:$0xff] }
  0x37   :  { %328 = vmatpush.msrb.mxu1 %v283_v14  ;;  %v116_v25 = vmul.f32 0.125, %v115_v24  ;;  %v165_v54 = vld [vmem:[#allocation8] sm:$0x7]  ;;  %v380_v3 = vld [vmem:[%s579_s4] ss:$0 sm:$0xff] }
  0x38   :  { %309 = vmatpush.msrb.mxu0 %v266_v13  ;;  %299 = vmatpush.msra.mxu3 %v240_v30  ;;  %v167_v55 = vperm.slane %v165_v54, 0  ;;  %v168_v56 = vperm.slane %v165_v54, 1  ;;  %v169_v61 = vperm.slane %v165_v54, 2 }
  0x39   :  { %329 = vmatpush.msrb.mxu1 %v282_v17  ;;  %189 = vmatmul.f32.vlgmr.msra.gmra.mxu0 %v116_v25 }
  0x3a   :  { %310 = vmatpush.msrb.mxu0 %v265_v16  ;;  %229 = vmatmul.f32.vlgmr.msra.gmra.mxu2 %v116_v25 }
  0x3b   :  { %330 = vmatpush.msrb.mxu1 %v281_v20  ;;  %300 = vmatpush.msra.mxu3 %v239_v33 }
  0x3c   :  { %311 = vmatpush.msrb.mxu0 %v264_v19  ;;  %209 = vmatmul.f32.vlgmr.msra.gmra.mxu1 %v116_v25 }
  0x3d   :  { %331 = vmatpush.msrb.mxu1 %v280_v23  ;;  %301 = vmatpush.msra.mxu3 %v238_v36 }
  0x3e   :  { %312 = vmatpush.msrb.mxu0 %v263_v22 }
  0x3f   :  { %332 = vmatpush.msrb.mxu1 %v279_v27  ;;  %302 = vmatpush.msra.mxu3 %v237_v39 }
  0x40   :  { %313 = vmatpush.msrb.mxu0 %v262_v26 }
  0x41   :  { %333 = vmatpush.msrb.mxu1 %v278_v29  ;;  %303 = vmatpush.msra.mxu3 %v236_v42 }
  0x42   :  { %314 = vmatpush.msrb.mxu0 %v261_v28 }
  0x43   :  { %334 = vmatpush.msrb.mxu1 %v277_v32 }
  0x44   :  { %315 = vmatpush.msrb.mxu0 %v260_v31 }
  0x45   :  { %335 = vmatpush.msrb.mxu1 %v276_v35 }
  0x46   :  { %316 = vmatpush.msrb.mxu0 %v259_v34 }
  0x47   :  { %336 = vmatpush.msrb.mxu1 %v275_v38 }
  0x48   :  { %317 = vmatpush.msrb.mxu0 %v258_v37 }
  0x49   :  { %337 = vmatpush.msrb.mxu1 %v274_v41 }
  0x4a   :  { %318 = vmatpush.msrb.mxu0 %v257_v40 }
  0x4b   :  { %338 = vmatpush.msrb.mxu1 %v273_v44 }
  0x4c   :  { %319 = vmatpush.msrb.mxu0 %v256_v43 }
  0x4d   :  { %339 = vmatpush.msrb.mxu1 %v272_v46 }
  0x4e   :  { %320 = vmatpush.msrb.mxu0 %v255_v45 }
  0x4f   :  { %340 = vmatpush.msrb.mxu1 %v271_v48 }
  0x50   :  { %321 = vmatpush.msrb.mxu0 %v254_v47 }
  0x51   :  { %341 = vmatpush.msrb.mxu1 %v270_v50 }
  0x52   :  { %322 = vmatpush.msrb.mxu0 %v253_v49 }
  0x53   :  { %342 = vmatpush.msrb.mxu1 %v269_v52 }
  0x54   :  { %323 = vmatpush.msrb.mxu0 %v252_v51 }
  0x55   :  { %343 = vmatpush.msrb.mxu1 %v268_v53 }
  0xb6   :  { %v190_v57 = vpop.f32.mrf.mxu0 }
  0xb7   :  { %v191_v58 = vadd.f32 %v190_v57, %v167_v55 }
  0xb9   :  { %v210_v59 = vpop.f32.mrf.mxu1  ;;  %381 = vtanh.f32 %v191_v58 }
  0xba   :  { %v211_v60 = vadd.f32 %v210_v59, %v168_v56 }
  0xbc   :  { %383 = vtanh.f32 %v211_v60 }
  0xbd   :  { %v230_v62 = vpop.f32.mrf.mxu2 }
  0xbe   :  { %v231_v63 = vadd.f32 %v230_v62, %v169_v61 }
  0xbf   :  { %v382_v0 = vpop.eup %381 }
  0xc0   :  { %385 = vtanh.f32 %v231_v63  ;;  %304 = vmatmul.f32.vlgmr.msra.gmra.mxu3 %v382_v0 }
  0xc2   :  { %v384_v1 = vpop.eup %383 }
  0xc3   :  { %324 = vmatmul.f32.vlgmr.msrb.gmra.mxu0 %v384_v1 }
  0xc6   :  { %v386_v2 = vpop.eup %385 }
  0xc7   :  { %344 = vmatmul.f32.vlgmr.msrb.gmra.mxu1 %v386_v2 }
 0x140   :  { %v325_v5 = vpop.f32.mrf.mxu0 }
 0x143   :  { %v305_v4 = vpop.f32.mrf.mxu3 }
 0x144   :  { %v306_v6 = vadd.f32 %v380_v3, %v305_v4  ;;  %v345_v7 = vpop.f32.mrf.mxu1 }
 0x146   :  { %v326_v8 = vadd.f32 %v325_v5, %v306_v6 }
 0x148   :  { %v346_v9 = vadd.f32 %v345_v7, %v326_v8 }
 0x14a   :  { %348 = vst [vmem:[#allocation11] sm:$0x3] %v346_v9 }
 0x14b   :  { %359 = dma.vmem_to_hbm [thread:$0]  %s355_s18, 32, %s357_s21, [#allocation5]  }
 0x14c   :  { %513 = dma.done.wait [#allocation5], 32  }
 0x14d   :  { %514 = vsyncadd [#allocation5], 4294967264 }
 0x14e   :  { %364 = vsyncpa [#allocation4], 1 }
 0x14f   :  { %365 = vsyncpa [#allocation7], 1 }
 0x150   :  { %366 = vsyncpa [#allocation10], 1 }
 0x151   :  { %367 = vsyncpa [#allocation5], 1 }

</bundles_post_ra>
